<compile_context>
chip_gen: v5e
topology: v5e:2x2
jax: 0.10.0
libtpu: 0.0.40
codegen_flags: <defaults>
</compile_context>

<pallas_src>
import jax
import jax.numpy as jnp
from jax.experimental import pallas as pl
from jax.experimental.pallas import tpu as pltpu


def _new_attention_kernel(neigh_ref, user_ref, w_ref, b_ref, out_ref):
    gq, n, dp = neigh_ref.shape             # quads in this tile, neighbors, packed width

    # Packed weights (bf16), all [dp, dp]:
    #   rows [0:dp)    = blockdiag(W1_neigh)   (att1, neighbor half)
    #   rows [dp:2dp)  = blockdiag(W1_user)    (att1, user half)
    #   rows [2dp:3dp) = blockdiag(W2)         (att2)
    #   rows [3dp:4dp) = segment-broadcast W3  (att3 -> logits replicated per segment)
    w1n = w_ref[0 * dp:1 * dp, :]
    w1u = w_ref[1 * dp:2 * dp, :]
    w2 = w_ref[2 * dp:3 * dp, :]
    w3b = w_ref[3 * dp:4 * dp, :]

    # Packed biases (f32): row 0 = b1 tiled, row 1 = b2 tiled. b3 omitted (softmax
    # is shift-invariant over the neighbor axis).
    b1 = b_ref[0:1, :]                       # [1, dp]
    b2 = b_ref[1:2, :]

    # N is a multiple of the 8-row sublane tile in the demo, so these leading-dim
    # reshapes are layout-preserving (no VMEM relayout).
    neigh = neigh_ref[...].reshape(gq * n, dp)        # bf16 [gq*N, dp]
    user = user_ref[...].reshape(gq, dp)              # bf16 [gq, dp]

    # att1 on concat([neigh, user_rep], 1) == neigh @ W1n + user @ W1u + b1.
    # The user half (and b1) is computed once per group and broadcast over its N
    # neighbors rather than per-row on replicated user rows.
    h_n = jnp.dot(neigh, w1n, preferred_element_type=jnp.float32)        # [gq*N, dp]
    h_u = jnp.dot(user, w1u, preferred_element_type=jnp.float32) + b1    # [gq, dp]
    h = jnp.maximum(h_n.reshape(gq, n, dp) + h_u[:, None, :], 0.0)       # ReLU, f32
    # F.dropout(training=False) -> identity  # TODO(synk): dropout only in training

    # att2
    h2 = jnp.dot(h.reshape(gq * n, dp).astype(w_ref.dtype), w2,
                 preferred_element_type=jnp.float32) + b2
    h2 = jnp.maximum(h2, 0.0)                                            # [gq*N, dp] f32

    # att3 as a segment-broadcast matmul: logits[r, j] = <h2[r, seg(j)], w3> for the
    # group owning lane-segment seg(j); replicated across each D-lane segment, so the
    # output stays lane-dense and no cross-lane gather is needed.
    logits = jnp.dot(h2.astype(w_ref.dtype), w3b,
                     preferred_element_type=jnp.float32).reshape(gq, n, dp)

    # softmax over the neighbor axis (rows within each quad), f32 throughout.
    m = jnp.max(logits, axis=1, keepdims=True)
    e = jnp.exp(logits - m)
    denom = jnp.sum(e, axis=1, keepdims=True)
    r = pl.reciprocal(denom, approx=True)     # EUP slot (otherwise idle)
    r = r * (2.0 - denom * r)                 # one Newton step -> ~f32-exact
    out_ref[...] = e * r


def pack_params(params, p, compute_dtype=jnp.bfloat16):
    """Build block-diagonal / segment-broadcast packed parameter buffers."""
    d = params["w2"].shape[0]
    eye = jnp.eye(p, dtype=jnp.float32)
    w1n_bd = jnp.kron(eye, params["w1"][:d])                      # [p*d, p*d]
    w1u_bd = jnp.kron(eye, params["w1"][d:])
    w2_bd = jnp.kron(eye, params["w2"])
    # att3: per-segment block is w3 broadcast across all d output lanes.
    w3_bc = jnp.kron(eye, jnp.broadcast_to(params["w3"], (d, d)))
    w_packed = jnp.concatenate([w1n_bd, w1u_bd, w2_bd, w3_bc],
                               axis=0).astype(compute_dtype)      # [4*p*d, p*d]
    b1_p = jnp.tile(params["b1"], (1, p))
    b2_p = jnp.tile(params["b2"], (1, p))
    pb_packed = jnp.concatenate([b1_p, b2_p], axis=0).astype(jnp.float32)   # [2, p*d]
    return w_packed, pb_packed


def new_attention_batched(user_emb, neigh_emb, params, *,
                          quads_per_block=None, compute_dtype=jnp.bfloat16):
    """user_emb: [G, D], neigh_emb: [G, N, D] -> attention weights [G, N]."""
    g, n, d = neigh_emb.shape
    assert user_emb.shape == (g, d)

    # Lane packing factor: P groups share one 128-lane row.
    p = 128 // d if (d <= 128 and 128 % d == 0) else 1
    dp = p * d

    quads = pl.cdiv(g, p)
    if quads_per_block is None:
        # Target at most 2 grid steps (one per v7x TensorCore); on 1-TC chips the
        # extra step is cheap and a single step is recovered by passing
        # quads_per_block=quads explicitly.
        quads_per_block = max(1, pl.cdiv(quads, 2))
    quads_padded = pl.cdiv(quads, quads_per_block) * quads_per_block
    g_padded = quads_padded * p

    # Pad with dummy (zero) groups; their outputs are discarded below.
    if g_padded != g:
        user_emb = jnp.concatenate(
            [user_emb, jnp.zeros((g_padded - g, d), user_emb.dtype)], axis=0)
        neigh_emb = jnp.concatenate(
            [neigh_emb, jnp.zeros((g_padded - g, n, d), neigh_emb.dtype)], axis=0)

    # Lane-pack P consecutive groups into one 128-lane row (group-major segments).
    neigh_packed = (neigh_emb.reshape(quads_padded, p, n, d)
                    .transpose(0, 2, 1, 3)
                    .reshape(quads_padded, n, dp)
                    .astype(compute_dtype))
    user_packed = user_emb.reshape(quads_padded, 1, dp).astype(compute_dtype)

    w_packed, pb_packed = pack_params(params, p, compute_dtype)

    out_full = pl.pallas_call(
        _new_attention_kernel,
        out_shape=jax.ShapeDtypeStruct((quads_padded, n, dp), jnp.float32),
        grid_spec=pltpu.PrefetchScalarGridSpec(
            num_scalar_prefetch=0,
            grid=(quads_padded // quads_per_block,),
            in_specs=[
                pl.BlockSpec((quads_per_block, n, dp), lambda i: (i, 0, 0)),  # neighbors
                pl.BlockSpec((quads_per_block, 1, dp), lambda i: (i, 0, 0)),  # users
                pl.BlockSpec((4 * dp, dp), lambda i: (0, 0)),                 # packed W (resident)
                pl.BlockSpec((2, dp), lambda i: (0, 0)),                      # packed biases
            ],
            out_specs=pl.BlockSpec((quads_per_block, n, dp), lambda i: (i, 0, 0)),
        ),
        compiler_params=pltpu.CompilerParams(
            dimension_semantics=("parallel",)),
    )(neigh_packed, user_packed, w_packed, pb_packed)

    # Un-pack: each group's attention row is replicated across its D-lane segment;
    # take lane 0 of every segment and restore [G, N] ordering.
    att = out_full.reshape(quads_padded, n, p, d)[:, :, :, 0]   # [quads, N, P]
    att = att.transpose(0, 2, 1).reshape(quads_padded * p, n)   # [G_padded, N]
    return att[:g]


def new_attention_forward(user_emb, neigh_emb, params, **kw):
    """PyTorch-style interface: UserEmb [1, D], neighEmb [N, D] -> [N, 1]."""
    n, d = neigh_emb.shape
    att = new_attention_batched(user_emb.reshape(1, d), neigh_emb.reshape(1, n, d),
                                params, **kw)
    return att.reshape(n, 1)


def new_attention_reference(user_emb, neigh_emb, params, compute_dtype=jnp.bfloat16):
    """Pure-JAX reference mirroring the kernel's bf16-operand / f32-accumulate numerics.

    b3 IS included here (and cancels under softmax), which validates dropping it
    inside the kernel.
    """
    g, n, d = neigh_emb.shape
    w1n = params["w1"][:d].astype(compute_dtype)
    w1u = params["w1"][d:].astype(compute_dtype)
    w2 = params["w2"].astype(compute_dtype)
    w3 = params["w3"].astype(compute_dtype)
    neigh = neigh_emb.astype(compute_dtype).reshape(g * n, d)
    user = user_emb.astype(compute_dtype)

    hn = jnp.dot(neigh, w1n, preferred_element_type=jnp.float32).reshape(g, n, d)
    hu = jnp.dot(user, w1u, preferred_element_type=jnp.float32) + params["b1"]
    h = jnp.maximum(hn + hu[:, None, :], 0.0)
    h = jnp.dot(h.reshape(g * n, d).astype(compute_dtype), w2,
                preferred_element_type=jnp.float32) + params["b2"]
    h = jnp.maximum(h, 0.0)
    logits = jnp.dot(h.astype(compute_dtype), w3,
                     preferred_element_type=jnp.float32).reshape(g, n)
    logits = logits + params["b3"].reshape(())
    return jax.nn.softmax(logits, axis=-1)


def init_params(key, d):
    """nn.Linear-style init; weights stored pre-transposed as [in, out]."""
    k1, k2, k3, k4, k5, k6 = jax.random.split(key, 6)
    s1 = 1.0 / jnp.sqrt(2.0 * d)
    s2 = 1.0 / jnp.sqrt(1.0 * d)
    return {
        "w1": jax.random.uniform(k1, (2 * d, d), jnp.float32, -s1, s1),  # att1 [2D -> D]
        "b1": jax.random.uniform(k2, (1, d), jnp.float32, -s1, s1),
        "w2": jax.random.uniform(k3, (d, d), jnp.float32, -s2, s2),      # att2 [D -> D]
        "b2": jax.random.uniform(k4, (1, d), jnp.float32, -s2, s2),
        "w3": jax.random.uniform(k5, (d, 1), jnp.float32, -s2, s2),      # att3 [D -> 1]
        "b3": jax.random.uniform(k6, (1, 1), jnp.float32, -s2, s2),
    }


if __name__ == "__main__":
    D = 32   # embedding_dims
    N = 8    # neighbors per user (one softmax group)
    G = 16   # number of (user, neighbor-group) problems batched into one pallas_call

    key = jax.random.PRNGKey(0)
    kp, ku, kn = jax.random.split(key, 3)

    params = init_params(kp, D)
    user_emb = jax.random.normal(ku, (G, D), jnp.float32)      # UserEmb per group
    neigh_emb = jax.random.normal(kn, (G, N, D), jnp.float32)  # neighEmb per group

    # Batched, lane-packed kernel: 4 groups per 128-lane row, 2 grid steps of
    # 2 quads (= 8 groups / 16 matmul rows) each -> one tile per v7x TensorCore.
    att = new_attention_batched(user_emb, neigh_emb, params)
    att = jax.block_until_ready(att)

    ref = new_attention_reference(user_emb, neigh_emb, params)
    assert att.shape == (G, N)
    assert jnp.allclose(att, ref, atol=1e-4), float(jnp.max(jnp.abs(att - ref)))
    assert jnp.allclose(jnp.sum(att, axis=-1), 1.0, atol=1e-4)

    # Single-group PyTorch-style interface: UserEmb [1, D], neighEmb [N, D] -> [N, 1]
    # (exercises the dummy-group padding path: G=1 is padded to one quad of 4).
    att1 = new_attention_forward(user_emb[:1], neigh_emb[0], params)
    att1 = jax.block_until_ready(att1)
    assert att1.shape == (N, 1)
    assert jnp.allclose(att1[:, 0], ref[0], atol=1e-4)

    print("KERNEL_OK")
</pallas_src>

<mosaic_0001>
module attributes {stable_mosaic.version = 11 : i64} {
  func.func @_new_attention_kernel(%arg0: i32, %arg1: memref<2x8x128xbf16, #tpu.memory_space<vmem>>, %arg2: memref<2x1x128xbf16, #tpu.memory_space<vmem>>, %arg3: memref<512x128xbf16, #tpu.memory_space<vmem>>, %arg4: memref<2x128xf32, #tpu.memory_space<vmem>>, %arg5: memref<2x8x128xf32, #tpu.memory_space<vmem>>) attributes {dimension_semantics = [#tpu.dimension_semantics<parallel>], iteration_bounds = array<i64: 2>, scalar_prefetch = 0 : i64, scratch_operands = 0 : i64, tpu.core_type = #tpu.core_type<tc>, window_params = [{transform_indices = @transform_0, window_bounds = array<i64: 2, 8, 128>}, {transform_indices = @transform_1, window_bounds = array<i64: 2, 1, 128>}, {pipeline_mode = #tpu.pipeline_mode<synchronous>, transform_indices = @transform_2, window_bounds = array<i64: 512, 128>}, {pipeline_mode = #tpu.pipeline_mode<synchronous>, transform_indices = @transform_3, window_bounds = array<i64: 2, 128>}, {transform_indices = @transform_4, window_bounds = array<i64: 2, 8, 128>}]} {
    %c0 = arith.constant 0 : index
    %c0_0 = arith.constant 0 : index
    %0 = vector.load %arg3[%c0, %c0_0] : memref<512x128xbf16, #tpu.memory_space<vmem>>, vector<128x128xbf16>
    %c128 = arith.constant 128 : index
    %c0_1 = arith.constant 0 : index
    %1 = vector.load %arg3[%c128, %c0_1] : memref<512x128xbf16, #tpu.memory_space<vmem>>, vector<128x128xbf16>
    %c256 = arith.constant 256 : index
    %c0_2 = arith.constant 0 : index
    %2 = vector.load %arg3[%c256, %c0_2] : memref<512x128xbf16, #tpu.memory_space<vmem>>, vector<128x128xbf16>
    %c384 = arith.constant 384 : index
    %c0_3 = arith.constant 0 : index
    %3 = vector.load %arg3[%c384, %c0_3] : memref<512x128xbf16, #tpu.memory_space<vmem>>, vector<128x128xbf16>
    %c0_4 = arith.constant 0 : index
    %c0_5 = arith.constant 0 : index
    %4 = vector.load %arg4[%c0_4, %c0_5] : memref<2x128xf32, #tpu.memory_space<vmem>>, vector<1x128xf32>
    %c1 = arith.constant 1 : index
    %c0_6 = arith.constant 0 : index
    %5 = vector.load %arg4[%c1, %c0_6] : memref<2x128xf32, #tpu.memory_space<vmem>>, vector<1x128xf32>
    %c0_7 = arith.constant 0 : index
    %c0_8 = arith.constant 0 : index
    %c0_9 = arith.constant 0 : index
    %6 = vector.load %arg1[%c0_7, %c0_8, %c0_9] : memref<2x8x128xbf16, #tpu.memory_space<vmem>>, vector<2x8x128xbf16>
    %7 = vector.shape_cast %6 : vector<2x8x128xbf16> to vector<16x128xbf16>
    %c0_10 = arith.constant 0 : index
    %c0_11 = arith.constant 0 : index
    %c0_12 = arith.constant 0 : index
    %8 = vector.load %arg2[%c0_10, %c0_11, %c0_12] : memref<2x1x128xbf16, #tpu.memory_space<vmem>>, vector<2x1x128xbf16>
    %9 = vector.shape_cast %8 : vector<2x1x128xbf16> to vector<2x128xbf16>
    %cst = arith.constant dense<0.000000e+00> : vector<16x128xf32>
    %10 = tpu.matmul %7, %0, %cst {dimension_numbers = #tpu.dot_dimension_numbers<[1], [0], [0], [1], [0, 0, 1, 1], [], []>} : vector<16x128xbf16>, vector<128x128xbf16>, vector<16x128xf32> -> vector<16x128xf32>
    %cst_13 = arith.constant dense<0.000000e+00> : vector<2x128xf32>
    %11 = tpu.matmul %9, %1, %cst_13 {dimension_numbers = #tpu.dot_dimension_numbers<[1], [0], [0], [1], [0, 0, 1, 1], [], []>} : vector<2x128xbf16>, vector<128x128xbf16>, vector<2x128xf32> -> vector<2x128xf32>
    %12 = vector.broadcast %4 : vector<1x128xf32> to vector<2x128xf32>
    %13 = arith.addf %11, %12 : vector<2x128xf32>
    %14 = vector.shape_cast %10 : vector<16x128xf32> to vector<2x8x128xf32>
    %15 = vector.shape_cast %13 : vector<2x128xf32> to vector<2x1x128xf32>
    %16 = vector.broadcast %15 : vector<2x1x128xf32> to vector<2x8x128xf32>
    %17 = arith.addf %14, %16 : vector<2x8x128xf32>
    %cst_14 = arith.constant 0.000000e+00 : f32
    %18 = vector.broadcast %cst_14 : f32 to vector<2x8x128xf32>
    %19 = arith.maximumf %17, %18 : vector<2x8x128xf32>
    %20 = vector.shape_cast %19 : vector<2x8x128xf32> to vector<16x128xf32>
    %21 = arith.truncf %20 : vector<16x128xf32> to vector<16x128xbf16>
    %cst_15 = arith.constant dense<0.000000e+00> : vector<16x128xf32>
    %22 = tpu.matmul %21, %2, %cst_15 {dimension_numbers = #tpu.dot_dimension_numbers<[1], [0], [0], [1], [0, 0, 1, 1], [], []>} : vector<16x128xbf16>, vector<128x128xbf16>, vector<16x128xf32> -> vector<16x128xf32>
    %23 = vector.broadcast %5 : vector<1x128xf32> to vector<16x128xf32>
    %24 = arith.addf %22, %23 : vector<16x128xf32>
    %cst_16 = arith.constant 0.000000e+00 : f32
    %25 = vector.broadcast %cst_16 : f32 to vector<16x128xf32>
    %26 = arith.maximumf %24, %25 : vector<16x128xf32>
    %27 = arith.truncf %26 : vector<16x128xf32> to vector<16x128xbf16>
    %cst_17 = arith.constant dense<0.000000e+00> : vector<16x128xf32>
    %28 = tpu.matmul %27, %3, %cst_17 {dimension_numbers = #tpu.dot_dimension_numbers<[1], [0], [0], [1], [0, 0, 1, 1], [], []>} : vector<16x128xbf16>, vector<128x128xbf16>, vector<16x128xf32> -> vector<16x128xf32>
    %29 = vector.shape_cast %28 : vector<16x128xf32> to vector<2x8x128xf32>
    %cst_18 = arith.constant dense<0xFF800000> : vector<2x128xf32>
    %30 = vector.multi_reduction <maximumf>, %29, %cst_18 [1] : vector<2x8x128xf32> to vector<2x128xf32>
    %31 = vector.shape_cast %30 : vector<2x128xf32> to vector<2x1x128xf32>
    %32 = vector.broadcast %31 : vector<2x1x128xf32> to vector<2x8x128xf32>
    %33 = arith.subf %29, %32 : vector<2x8x128xf32>
    %34 = math.exp %33 : vector<2x8x128xf32>
    %cst_19 = arith.constant dense<0.000000e+00> : vector<2x128xf32>
    %35 = vector.multi_reduction <add>, %34, %cst_19 [1] : vector<2x8x128xf32> to vector<2x128xf32>
    %36 = vector.shape_cast %35 : vector<2x128xf32> to vector<2x1x128xf32>
    %37 = tpu.reciprocal %36 {approx = true} : vector<2x1x128xf32> -> vector<2x1x128xf32>
    %38 = arith.mulf %36, %37 : vector<2x1x128xf32>
    %cst_20 = arith.constant 2.000000e+00 : f32
    %39 = vector.broadcast %cst_20 : f32 to vector<2x1x128xf32>
    %40 = arith.subf %39, %38 : vector<2x1x128xf32>
    %41 = arith.mulf %37, %40 : vector<2x1x128xf32>
    %42 = vector.broadcast %41 : vector<2x1x128xf32> to vector<2x8x128xf32>
    %43 = arith.mulf %34, %42 : vector<2x8x128xf32>
    %c0_21 = arith.constant 0 : index
    %c0_22 = arith.constant 0 : index
    %c0_23 = arith.constant 0 : index
    %44 = vector.load %arg5[%c0_21, %c0_22, %c0_23] : memref<2x8x128xf32, #tpu.memory_space<vmem>>, vector<2x8x128xf32>
    tpu.vector_store %arg5[%c0_21, %c0_22, %c0_23], %43 {strides = array<i32>} : memref<2x8x128xf32, #tpu.memory_space<vmem>>, vector<2x8x128xf32>,
    return
  }
  func.func @transform_0(%arg0: i32) -> (i32, i32, i32) {
    %c0_i32 = arith.constant 0 : i32
    %c0_i32_0 = arith.constant 0 : i32
    %c0_i32_1 = arith.constant 0 : i32
    return %arg0, %c0_i32, %c0_i32_0 : i32, i32, i32
  }
  func.func @transform_1(%arg0: i32) -> (i32, i32, i32) {
    %c0_i32 = arith.constant 0 : i32
    %c0_i32_0 = arith.constant 0 : i32
    %c0_i32_1 = arith.constant 0 : i32
    return %arg0, %c0_i32, %c0_i32_0 : i32, i32, i32
  }
  func.func @transform_2(%arg0: i32) -> (i32, i32) {
    %c0_i32 = arith.constant 0 : i32
    %c0_i32_0 = arith.constant 0 : i32
    %c0_i32_1 = arith.constant 0 : i32
    return %c0_i32, %c0_i32_0 : i32, i32
  }
  func.func @transform_3(%arg0: i32) -> (i32, i32) {
    %c0_i32 = arith.constant 0 : i32
    %c0_i32_0 = arith.constant 0 : i32
    %c0_i32_1 = arith.constant 0 : i32
    return %c0_i32, %c0_i32_0 : i32, i32
  }
  func.func @transform_4(%arg0: i32) -> (i32, i32, i32) {
    %c0_i32 = arith.constant 0 : i32
    %c0_i32_0 = arith.constant 0 : i32
    %c0_i32_1 = arith.constant 0 : i32
    return %arg0, %c0_i32, %c0_i32_0 : i32, i32, i32
  }
}

</mosaic_0001>

<bundles_post_ra>
// kernel: tpu_custom_call.1
= control target key start
LH: loop header
LB: loop body
LE: loop exit
PB: predicated region body
PF: predicated region fallthrough
CT: control target
= control target key end

     0   :  { %9 = vsyncpa [#allocation3], 0  ;;  %s1335_s0 = inlined_call_operand.hbm [shape: bf16[4,8,128], index: 0, kind: input, shape index: {}]   ;;  %s1336_s1 = inlined_call_operand.vmem [shape: bf16[4,1,128], index: 1, kind: input, shape index: {}]   ;;  %s1337_s2 = inlined_call_operand.hbm [shape: bf16[512,128], index: 2, kind: input, shape index: {}]   ;;  %s1338_s3 = inlined_call_operand.vmem [shape: f32[2,128], index: 3, kind: input, shape index: {}]   ;;  %s1339_s4 = inlined_call_operand.hbm [shape: f32[4,8,128], index: 4, kind: output, shape index: {}]  }
   0x1   :  { %11 = vsyncpa [#allocation3 + $0x1], 0 }
   0x2   :  { %12 = vsyncpa [#allocation6], 0 }
   0x3   :  { %13 = vsyncpa [#allocation4], 0 }
   0x4   :  { %15 = vsyncpa [#allocation4 + $0x1], 0  ;;  %s1177_s15 = smov 0   ;;  %s1179_s16 = smov 0  }
   0x5   :  { %s1181_s17 = smov 0   ;;  %s1183_s18 = smov 0  }
   0x6 LB: > { %s1198_s19 = sadd.s32 4294967295, %s1145_s18   ;;  %s760_s20 = sadd.s32 4294967294, %s1145_s18   ;;  %s1145_s18 = sphi %s1183_s18, %s1349_s18   ;;  %s1141_s17 = sphi %s1181_s17, %s1348_s17   ;;  %s1137_s16 = sphi %s1179_s16, %s1347_s16   ;;  %s1133_s15 = sphi %s1177_s15, %s1346_s15  }
   0x7   : > { %p41_p0 = scmp.ne.s32.totalorder %s1137_s16, %s1133_s15  ;;  %p42_p1 = scmp.eq.s32.totalorder %s1198_s19, 0 }
   0x8   : > { %p133_p2 = scmp.eq.s32.totalorder %s1198_s19, 1  ;;  %p139_p3 = scmp.eq.s32.totalorder %s760_s20, 1 }
   0x9   : > { %p1207_p4 = por %p42_p1, %p41_p0  ;;  %p761_p5 = scmp.ge.s32.totalorder %s1145_s18, 1 }
   0xa   : > { %p1212_p6 = por %p139_p3, %p41_p0  ;;  %p146_p7 = scmp.lt.s32.totalorder %s1145_s18, 3 }
   0xb   : > { %s157_s25 = sshll.u32 %s1337_s2, 4  ;;  %s1147_s27 = smov [#allocation5]   ;;  %s158_s25 = int_to_ptr.hbm [resolvable:$true] %s157_s25 }
   0xc   : > { %p1220_p8 = pnand %p761_p5, %p146_p7  ;;  %s159_s28 = sshll.u32 %s1147_s27, 4  ;;  %s160_s28 = int_to_ptr.vmem [resolvable:$true] %s159_s28 }
   0xd   : > { %s1230_s29 = sadd.s32 1, %s1145_s18   ;;  %s1148_s30 = smov 64  }
   0xe   : > { %p952_p9 = pneg %p1220_p8  ;;  %s1149_s5 = smov 4  }
   0xf   : > { %s25_s6 = ssub.s32 %s1145_s18, %s1230_s29  ;;  %s28_s7 = sadd.s32 1, %s1141_s17 }
  0x10   : > { %p953_p10 = pnand %p952_p9, %p42_p1  ;;  %p26_p12 = scmp.eq.s32.totalorder %s25_s6, 0 }
  0x11   : > { %p35_p13 = scmp.ne.s32.totalorder %s1141_s17, %s1137_s16  ;;  %p36_p0 = scmp.eq.s32.totalorder %s1145_s18, 0 }
  0x12   : > { %955 = dma.hbm_to_vmem [thread:$0]  (!%p953_p10), %s158_s25, 4096, %s160_s28, [#allocation6], %s1148_s30, %s1148_s30, %s1149_s5  }
  0x13   : > { %s1242_s8 = scalar_select %p26_p12, %s1141_s17, %s28_s7  }
  0x14   : > { %p1246_p3 = por %p133_p2, %p35_p13  ;;  %p965_p5 = scmp.lt.s32.totalorder %s1145_s18, 2 }
  0x15   : > { %s176_s10 = sand.u32 1, %s1141_s17   ;;  %s909_s11 = sshll.u32 %s1145_s18, 3 }
  0x16   : > { %p37_p7 = por %p36_p0, %p35_p13  ;;  %s764_s12 = sshll.u32 %s176_s10, 3 }
  0x17   : > { %s185_s20 = scalar_lea.hbm %s1335_s0, %s909_s11  ;;  %s180_s24 = scalar_lea.vmem [#allocation2], %s764_s12 }
  0x18   : > { %s186_s23 = sshll.u32 %s185_s20, 4  ;;  %s188_s25 = sshll.u32 %s180_s24, 4  ;;  %s187_s23 = int_to_ptr.hbm [resolvable:$true] %s186_s23  ;;  %s189_s25 = int_to_ptr.vmem [resolvable:$true] %s188_s25 }
  0x19   : > { %p1256_p9 = pnand %p965_p5, %p37_p7  ;;  %s177_s28 = scalar_lea.sflag [#allocation3], %s176_s10 }
  0x1a   : > { %s1045_s6 = sshra.s32 %s187_s23, 4  ;;  %s1052_s12 = scalar_lea.hbm %s1335_s0, 16  ;;  %s1046_s6 = int_to_ptr.hbm [resolvable:$true] %s1045_s6 }
  0x1b   : > { %s1047_s7 = scalar_lea.hbm %s1046_s6, 8  ;;  %p1049_p10 = pneg %p1256_p9 }
  0x1c   : > { %p1048_p2 = scmp.ne.s32.totalorder %s1046_s6, %s1047_s7  ;;  %p1053_p0 = scmp.lt.s32.totalorder %s1046_s6, %s1335_s0 }
  0x1d   : > { %p1054_p5 = scmp.lt.s32.totalorder %s1052_s12, %s1047_s7 }
  0x1e   : > { %p1050_p12 = pnand %p1049_p10, %p1048_p2 }
  0x1f   : > { %p1055_p7 = por %p1054_p5, %p1053_p0 }
  0x20   : > { %p1051_p13 = pneg %p1050_p12 }
  0x22   : > { %p1056_p11 = pnand %p1055_p7, %p1051_p13 }
  0x24   : > { %1059 = shalt.err (!%p1056_p11)
}
  0x25   : > { %959 = dma.hbm_to_vmem [thread:$0]  (!%p1256_p9), %s187_s23, 128, %s189_s25, %s177_s28, %s1148_s30, %s1148_s30, %s1149_s5  }
  0x26   : > { %208 = sbr.rel (%p1220_p8) target bundleno = 558 (0x22e), region = 36  ;;  %s1276_s10 = sand.u32 (!%p1220_p8), 1, %s1137_s16  }
  0x27   : > { %s768_s24 = sshll.u32 (!%p1220_p8), %s1276_s10, 3  ;;  %s211_s6 = scalar_lea.sflag (!%p1220_p8), [#allocation3], %s1276_s10 }
  0x28   : > { %s1280_s7 = scalar_lea.vmem (!%p1220_p8), [#allocation2], %s768_s24 }
  0x2b   : > { %1120 = dma.done.wait (%p1207_p4), %s211_s6, 128  }
  0x2c   : > { %1122 = vsyncadd (%p1207_p4), %s211_s6, 4294967168 }
  0x2d   : > { %1124 = dma.done.wait (%p42_p1), [#allocation6], 4096  }
  0x2e   : > { %1126 = vsyncadd (%p42_p1), [#allocation6], 4294963200  ;;  %s771_s26 = sshll.u32 %s1198_s19, 1  ;;  %v917_v0 = vld [vmem:[#allocation5 + $0x38] sm:$0xff]  ;;  %v916_v2 = vld [vmem:[#allocation5 + $0x30] sm:$0xff]  ;;  %vm406_vm0 = vcmask 1041409  }
  0x2f   : > { %p251_p8 = scmp.lt.s32.totalorder %s771_s26, 3  ;;  %v925_v1 = vld [vmem:[#allocation5 + $0x78] sm:$0xff]  ;;  %380 = vmatpush.bf16.msra.mxu0 %v917_v0  ;;  %v924_v3 = vld [vmem:[#allocation5 + $0x70] sm:$0xff]  ;;  %v915_v5 = vld [vmem:[#allocation5 + $0x28] sm:$0xff]  ;;  %s770_s11 = sshll.u32 %s1276_s10, 4 }
  0x30   : > { %458 = vmatpush.bf16.msra.mxu1 %v925_v1  ;;  %v923_v6 = vld [vmem:[#allocation5 + $0x68] sm:$0xff]  ;;  %v933_v7 = vld [vmem:[#allocation5 + $0xb8] sm:$0xff]  ;;  %v932_v8 = vld [vmem:[#allocation5 + $0xb0] sm:$0xff]  ;;  %s943_s13 = sshll.u32 %s1198_s19, 4  ;;  %s248_s24 = scalar_lea.vmem [#allocation7], %s770_s11 }
  0x31   : > { %s1351_s26 = smov (!%p251_p8, %s771_s26), 3  ;;  %531 = vmatpush.bf16.msra.mxu2 %v933_v7  ;;  %v914_v9 = vld [vmem:[#allocation5 + $0x20] sm:$0xff]  ;;  %v931_v12 = vld [vmem:[#allocation5 + $0xa8] sm:$0xff]  ;;  %v913_v14 = vld [vmem:[#allocation5 + $0x18] sm:$0xff]  ;;  %s664_s20 = scalar_lea.hbm %s1339_s4, %s943_s13 }
  0x32   : > { %s253_s21 = scalar_lea.vmem %s1336_s1, %s1351_s26  ;;  %v922_v10 = vld [vmem:[#allocation5 + $0x60] sm:$0xff]  ;;  %v921_v15 = vld [vmem:[#allocation5 + $0x58] sm:$0xff]  ;;  %v912_v17 = vld [vmem:[#allocation5 + $0x10] sm:$0xff]  ;;  %s665_s6 = sshll.u32 %s248_s24, 4  ;;  %s666_s6 = int_to_ptr.vmem [resolvable:$true] %s665_s6 }
  0x33   : > { %v324_v4 = vld [vmem:[%s253_s21] sm:$0x1]  ;;  %381 = vmatpush.bf16.msra.mxu0 %v916_v2  ;;  %v325_v11 = vld [vmem:[%s253_s21 + $0x1] sm:$0x1]  ;;  %v930_v16 = vld [vmem:[#allocation5 + $0xa0] sm:$0xff]  ;;  %s653_s26 = scalar_lea.sflag [#allocation4], %s1276_s10 }
  0x34   : > { %459 = vmatpush.bf16.msra.mxu1 %v924_v3  ;;  %396 = vst [vmem:[#allocation1] ss:$9 sm:$0xff] %v324_v4  ;;  %v920_v18 = vld [vmem:[#allocation5 + $0x50] sm:$0xff]  ;;  %v911_v20 = vld [vmem:[#allocation5 + $0x8] sm:$0xff]  ;;  %v910_v25 = vld [vmem:[#allocation5] sm:$0xff]  ;;  %s1095_s23 = scalar_lea.hbm %s1339_s4, 32 }
  0x35   : > { %532 = vmatpush.bf16.msra.mxu2 %v932_v8  ;;  %v919_v21 = vld [vmem:[#allocation5 + $0x48] sm:$0xff]  ;;  %v918_v26 = vld [vmem:[#allocation5 + $0x40] sm:$0xff]  ;;  %v942_v28 = vld [vmem:[%s1280_s7] sm:$0xff]  ;;  %s667_s7 = sshll.u32 %s664_s20, 4  ;;  %s668_s7 = int_to_ptr.hbm [resolvable:$true] %s667_s7 }
  0x36   : > { %v929_v30 = vld [vmem:[#allocation5 + $0x98] sm:$0xff]  ;;  %v928_v31 = vld [vmem:[#allocation5 + $0x90] sm:$0xff]  ;;  %v927_v32 = vld [vmem:[#allocation5 + $0x88] sm:$0xff]  ;;  %s1089_s19 = sshra.s32 %s668_s7, 4  ;;  %s1090_s19 = int_to_ptr.hbm [resolvable:$true] %s1089_s19 }
  0x37   : > { %382 = vmatpush.bf16.msra.mxu0 %v915_v5  ;;  %v926_v33 = vld [vmem:[#allocation5 + $0x80] sm:$0xff]  ;;  %v941_v34 = vld [vmem:[#allocation5 + $0xf8] sm:$0xff]  ;;  %v940_v35 = vld [vmem:[#allocation5 + $0xf0] sm:$0xff]  ;;  %s1091_s30 = scalar_lea.hbm %s1090_s19, 16  ;;  %p1096_p9 = scmp.lt.s32.totalorder %s1090_s19, %s1339_s4 }
  0x38   : > { %460 = vmatpush.bf16.msra.mxu1 %v923_v6  ;;  %596 = vmatpush.bf16.msra.mxu3 %v941_v34  ;;  %v939_v36 = vld [vmem:[#allocation5 + $0xe8] sm:$0xff]  ;;  %v938_v37 = vld [vmem:[#allocation5 + $0xe0] sm:$0xff]  ;;  %v937_v52 = vld [vmem:[#allocation5 + $0xd8] sm:$0xff]  ;;  %p1092_p1 = scmp.ne.s32.totalorder %s1090_s19, %s1091_s30  ;;  %p1097_p2 = scmp.lt.s32.totalorder %s1095_s23, %s1091_s30 }
  0x39   : > { %533 = vmatpush.bf16.msra.mxu2 %v931_v12  ;;  %v1005_v38 = vld [vmem:[%s1338_s3] ss:$0 sm:$0xff]  ;;  %v936_v53 = vld [vmem:[#allocation5 + $0xd0] sm:$0xff]  ;;  %v934_v55 = vld [vmem:[#allocation5 + $0xc0] sm:$0xff] }
  0x3a   : > { %v935_v54 = vld [vmem:[#allocation5 + $0xc8] sm:$0xff]  ;;  %p1093_p4 = pnand %p1092_p1, %p1246_p3  ;;  %p1098_p10 = por %p1097_p2, %p1096_p9 }
  0x3b   : > { %v397_v13 = vld [vmem:[#allocation1] sm:$0xf]  ;;  %383 = vmatpush.bf16.msra.mxu0 %v914_v9 }
  0x3c   : > { %461 = vmatpush.bf16.msra.mxu1 %v922_v10  ;;  %400 = vst [vmem:[#allocation1] ss:$9 sm:$0xff] %v325_v11  ;;  %v403_v22 = vunpack.c.l.b16 %v397_v13  ;;  %597 = vmatpush.bf16.msra.mxu3 %v940_v35  ;;  %v1006_v57 = vld [vmem:[%s1338_s3 + $0x1] ss:$0 sm:$0xff]  ;;  %p1094_p11 = pneg %p1093_p4 }
  0x3d   : > { %534 = vmatpush.bf16.msra.mxu2 %v930_v16 }
  0x3e   : > { %p1099_p12 = pnand %p1098_p10, %p1094_p11 }
  0x3f   : > { %384 = vmatpush.bf16.msra.mxu0 %v913_v14 }
  0x40   : > { %462 = vmatpush.bf16.msra.mxu1 %v921_v15  ;;  %598 = vmatpush.bf16.msra.mxu3 %v939_v36 }
  0x41   : > { %535 = vmatpush.bf16.msra.mxu2 %v929_v30 }
  0x43   : > { %v401_v19 = vld [vmem:[#allocation1] sm:$0xf]  ;;  %385 = vmatpush.bf16.msra.mxu0 %v912_v17 }
  0x44   : > { %463 = vmatpush.bf16.msra.mxu1 %v920_v18  ;;  %v404_v23 = vunpack.c.l.b16 %v401_v19  ;;  %599 = vmatpush.bf16.msra.mxu3 %v938_v37 }
  0x45   : > { %536 = vmatpush.bf16.msra.mxu2 %v928_v31 }
  0x46   : > { %v405_v24 = vrot.slane %v404_v23, 7 }
  0x47   : > { %386 = vmatpush.bf16.msra.mxu0 %v911_v20 }
  0x48   : > { %464 = vmatpush.bf16.msra.mxu1 %v919_v21  ;;  %v407_v27 = vsel %vm406_vm0, %v405_v24, %v403_v22  ;;  %600 = vmatpush.bf16.msra.mxu3 %v937_v52 }
  0x49   : > { %v408_v29 = vpack.c.b16 %v407_v27, %v407_v27  ;;  %537 = vmatpush.bf16.msra.mxu2 %v927_v32 }
  0x4b   : > { %387 = vmatpush.bf16.msra.mxu0 %v910_v25 }
  0x4c   : > { %465 = vmatpush.bf16.msra.mxu1 %v918_v26  ;;  %601 = vmatpush.bf16.msra.mxu3 %v936_v53 }
  0x4d   : > { %538 = vmatpush.bf16.msra.mxu2 %v926_v33 }
  0x4e   : > { %388 = vmatmul.bf16.vlgmr.msra.gmra.mxu0 %v942_v28 }
  0x4f   : > { %466 = vmatmul.bf16.vlgmr.msra.gmra.mxu1 %v408_v29 }
  0x50   : > { %602 = vmatpush.bf16.msra.mxu3 %v935_v54 }
  0x54   : > { %603 = vmatpush.bf16.msra.mxu3 %v934_v55 }
  0xcb   : > { %v389_v39 = vpop.f32.mrf.mxu0 }
  0xcc   : > { %v467_v40 = vpop.f32.mrf.mxu1 }
  0xcd   : > { %v468_v41 = vadd.f32 %v1005_v38, %v467_v40 }
  0xcf   : > { %v472_v42 = vrot.slane %v468_v41, 1  ;;  %v473_v43 = vperm.slane %v468_v41, 0 }
  0xd1   : > { %v474_v44 = vperm.slane %v472_v42, 0  ;;  %v477_v45 = vadd.f32 %v473_v43, %v389_v39 }
  0xd3   : > { %v391_v46 = vpop.f32.mrf.mxu0  ;;  %v479_v50 = vmax.f32 %v477_v45, 0.0 }
  0xd4   : > { %v469_v47 = vpop.f32.mrf.mxu1  ;;  %v478_v48 = vadd.f32 %v474_v44, %v391_v46 }
  0xd6   : > { %v480_v49 = vmax.f32 %v478_v48, 0.0 }
  0xd8   : > { %v481_v51 = vpack.c.bf16 %v480_v49, %v479_v50 }
  0xda   : > { %539 = vmatmul.bf16.vlgmr.msra.gmra.mxu2 %v481_v51 }
 0x15d   : > { %v540_v56 = vpop.f32.mrf.mxu2 }
 0x15e   : > { %v541_v58 = vadd.f32 %v1006_v57, %v540_v56 }
 0x160   : > { %v545_v61 = vmax.f32 %v541_v58, 0.0 }
 0x165   : > { %v542_v59 = vpop.f32.mrf.mxu2 }
 0x166   : > { %v543_v60 = vadd.f32 %v1006_v57, %v542_v59 }
 0x168   : > { %v546_v62 = vmax.f32 %v543_v60, 0.0 }
 0x16a   : > { %v547_v63 = vpack.c.bf16 %v546_v62, %v545_v61 }
 0x16c   : > { %604 = vmatmul.bf16.vlgmr.msra.gmra.mxu3 %v547_v63 }
 0x1ef   : > { %v605_v0 = vpop.f32.mrf.mxu3 }
 0x1f0   : > { %v610_v1 = vrot.slane %v605_v0, 4 }
 0x1f2   : > { %v611_v2 = vmax.f32 %v605_v0, %v610_v1 }
 0x1f4   : > { %v612_v3 = vrot.slane %v611_v2, 2 }
 0x1f6   : > { %v613_v4 = vmax.f32 %v611_v2, %v612_v3 }
 0x1f7   : > { %v607_v5 = vpop.f32.mrf.mxu3 }
 0x1f8   : > { %v614_v6 = vrot.slane %v613_v4, 1  ;;  %v616_v7 = vrot.slane %v607_v5, 4 }
 0x1fa   : > { %v615_v8 = vmax.f32 %v613_v4, %v614_v6  ;;  %v617_v9 = vmax.f32 %v607_v5, %v616_v7 }
 0x1fc   : > { %v622_v10 = vsub.f32 %v605_v0, %v615_v8  ;;  %v618_v11 = vrot.slane %v617_v9, 2 }
 0x1fe   : > { %v624_v12 = vmul.f32 1.442695, %v622_v10  ;;  %v619_v13 = vmax.f32 %v617_v9, %v618_v11 }
 0x200   : > { %1007 = vpow2.f32 %v624_v12  ;;  %v620_v14 = vrot.slane %v619_v13, 1 }
 0x202   : > { %v621_v15 = vmax.f32 %v619_v13, %v620_v14 }
 0x204   : > { %v623_v16 = vsub.f32 %v607_v5, %v621_v15 }
 0x206   : > { %v1008_v17 = vpop.eup %1007  ;;  %v626_v18 = vmul.f32 1.442695, %v623_v16 }
 0x207   : > { %v628_v19 = vrot.slane %v1008_v17, 4 }
 0x208   : > { %1009 = vpow2.f32 %v626_v18 }
 0x209   : > { %v629_v20 = vadd.f32 %v1008_v17, %v628_v19 }
 0x20b   : > { %v630_v21 = vrot.slane %v629_v20, 2 }
 0x20d   : > { %v631_v22 = vadd.f32 %v630_v21, %v629_v20 }
 0x20e   : > { %v1010_v23 = vpop.eup %1009 }
 0x20f   : > { %v632_v24 = vrot.slane %v631_v22, 1  ;;  %v634_v25 = vrot.slane %v1010_v23, 4 }
 0x211   : > { %v633_v26 = vadd.f32 %v632_v24, %v631_v22  ;;  %v635_v27 = vadd.f32 %v1010_v23, %v634_v25 }
 0x213   : > { %1011 = vrcp.f32 %v633_v26  ;;  %v636_v28 = vrot.slane %v635_v27, 2 }
 0x215   : > { %v637_v29 = vadd.f32 %v636_v28, %v635_v27 }
 0x217   : > { %v638_v30 = vrot.slane %v637_v29, 1 }
 0x219   : > { %v1012_v31 = vpop.eup %1011  ;;  %v639_v32 = vadd.f32 %v638_v30, %v637_v29 }
 0x21a   : > { %v642_v33 = vmul.f32 %v1012_v31, %v633_v26 }
 0x21b   : > { %1013 = vrcp.f32 %v639_v32 }
 0x21c   : > { %v644_v34 = vsub.f32 2.0, %v642_v33 }
 0x21e   : > { %v646_v35 = vmul.f32 %v1012_v31, %v644_v34 }
 0x220   : > { %v648_v36 = vmul.f32 %v1008_v17, %v646_v35 }
 0x221   : > { %v1014_v37 = vpop.eup %1013 }
 0x222   : > { %v643_v38 = vmul.f32 %v1014_v37, %v639_v32  ;;  %650 = vst [vmem:[%s248_s24] sm:$0xff] %v648_v36 }
 0x224   : > { %v645_v39 = vsub.f32 2.0, %v643_v38 }
 0x226   : > { %v647_v40 = vmul.f32 %v1014_v37, %v645_v39 }
 0x228   : > { %v649_v41 = vmul.f32 %v1010_v23, %v647_v40 }
 0x22a   : > { %651 = vst [vmem:[%s248_s24 + $0x8] sm:$0xff] %v649_v41 }
 0x22b   : > { %1102 = shalt.err (!%p1099_p12)
}
 0x22c   : > { %s1150_s10 = smov 128   ;;  %s1151_s28 = smov 8  }
 0x22d   : > { %950 = dma.vmem_to_hbm [thread:$0]  (%p1246_p3), %s666_s6, 256, %s668_s7, %s653_s26, %s1150_s10, %s1150_s10, %s1151_s28  }
 0x22e PF: > { %s682_s11 = sand.u32 1, %s1133_s15   ;;  %p1345_p13 = scmp.ge.s32.totalorder %s1145_s18, 2 }
 0x22f   : > { %s683_s13 = scalar_lea.sflag [#allocation4], %s682_s11 }
 0x230   : > { %p961_p0 = pnand %p1345_p13, %p1212_p6 }
 0x232   : > { %p962_p5 = pneg %p961_p0 }
 0x234   : > { %1128 = dma.done.wait (%p962_p5), %s683_s13, 256  }
 0x235   : > { %1130 = vsyncadd (%p962_p5), %s683_s13, 4294967040  ;;  %p18_p7 = scmp.ge.s32.totalorder %s1230_s29, 4   ;;  %s1346_s15 = smov %s1137_s16 }
 0x236   : > { %s1347_s16 = smov %s1141_s17  ;;  %s1348_s17 = smov %s1242_s8 }
 0x237   : > { %s1349_s18 = smov %s1230_s29  ;;  %20 = sbr.rel (!%p18_p7) target bundleno = 6 (0x6), region = 88 }
 0x23c   :  { %689 = vsyncpa [#allocation3], 1 }
 0x23d   :  { %691 = vsyncpa [#allocation3 + $0x1], 1 }
 0x23e   :  { %692 = vsyncpa [#allocation6], 1 }
 0x23f   :  { %693 = vsyncpa [#allocation4], 1 }
 0x240   :  { %695 = vsyncpa [#allocation4 + $0x1], 1 }

</bundles_post_ra>
